<compile_context>
chip_gen: v5e
topology: v5e:2x2
jax: 0.10.0
libtpu: 0.0.40
codegen_flags: <defaults>
</compile_context>

<pallas_src>
import jax
import jax.numpy as jnp
from jax.experimental import pallas as pl
from jax.experimental.pallas import tpu as pltpu


IN_FEATURES = 28 * 28   # 784
OUT_FEATURES = 10


def linear_kernel(x_ref, wt_ref, b_ref, o_ref):
    # One batch tile: o = x @ Wt + b  (all f32, MXU accumulate in f32)
    #   x_ref : (TB, K) f32   streamed tile (dominant HBM traffic)
    #   wt_ref: (K, N)  f32   VMEM-resident across all grid steps
    #   b_ref : (1, N)  f32   VMEM-resident bias row
    #   o_ref : (TB, N) f32   true 10-wide output (no padding, no slice)
    o_ref[...] = jnp.dot(x_ref[...], wt_ref[...],
                         preferred_element_type=jnp.float32) + b_ref[...]


def net_forward(x, w, b, *, block_batch=2048):
    """Forward pass of Net.

    x: (B, in_features) f32
    w: (out_features, in_features) f32  (PyTorch nn.Linear layout)
    b: (out_features,) f32
    returns: (B, out_features) f32
    """
    B, K = x.shape
    N, K2 = w.shape
    assert K == K2

    wt = w.T                     # (K, N) — tiny (31 KB), stays VMEM-resident
    b2 = b.reshape(1, N)

    # Batch tile selection:
    #  * B very large: use the full block_batch tile.
    #  * otherwise: split the batch into at least 2 tiles (when possible) so
    #    the "parallel" grid axis can use both TensorCores on v7x, rounding
    #    the tile up to a sublane multiple of 8.
    if B >= 2 * block_batch:
        tb = block_batch
    else:
        tb = max(8, ((-(-B // 2) + 7) // 8) * 8)   # ceil(B/2) -> multiple of 8
        tb = min(tb, block_batch)

    grid = (pl.cdiv(B, tb),)     # ragged last tile: over-read x, masked stores

    cost = pl.CostEstimate(
        flops=2 * B * K * N,
        transcendentals=0,
        bytes_accessed=4 * (B * K + K * N + N + B * N),
    )

    return pl.pallas_call(
        linear_kernel,
        out_shape=jax.ShapeDtypeStruct((B, N), jnp.float32),
        grid=grid,
        in_specs=[
            pl.BlockSpec((tb, K), lambda i: (i, 0)),   # streamed x tile (f32)
            pl.BlockSpec((K, N), lambda i: (0, 0)),    # resident Wt
            pl.BlockSpec((1, N), lambda i: (0, 0)),    # resident bias row
        ],
        out_specs=pl.BlockSpec((tb, N), lambda i: (i, 0)),
        compiler_params=pltpu.CompilerParams(
            dimension_semantics=("parallel",),         # 2nd TC on v7x
            vmem_limit_bytes=32 * 1024 * 1024,
        ),
        cost_estimate=cost,
    )(x, wt, b2)


def init_params(key, in_features, out_features):
    # Deterministic init mimicking PyTorch nn.Linear default:
    #   U(-1/sqrt(in_features), 1/sqrt(in_features)) for both W and b.
    kw, kb = jax.random.split(key)
    bound = 1.0 / jnp.sqrt(jnp.float32(in_features))
    w = jax.random.uniform(kw, (out_features, in_features),
                           dtype=jnp.float32, minval=-bound, maxval=bound)
    b = jax.random.uniform(kb, (out_features,),
                           dtype=jnp.float32, minval=-bound, maxval=bound)
    return w, b


def _reference(x, w, b):
    # Exact f32 reference (no bf16 pre-cast anymore).
    return x @ w.T + b


if __name__ == "__main__":
    key = jax.random.PRNGKey(0)
    k_x, k_p = jax.random.split(key)

    w, b = init_params(k_p, IN_FEATURES, OUT_FEATURES)

    # Case 1: tiny batch -> single tile, single grid step.
    batch = 8
    x = jax.random.normal(k_x, (batch, IN_FEATURES), dtype=jnp.float32)
    y = net_forward(x, w, b)
    jax.block_until_ready(y)
    assert y.shape == (batch, OUT_FEATURES)
    assert jnp.allclose(y, _reference(x, w, b), atol=2e-2, rtol=2e-2)

    # Case 2: batch not a multiple of the tile with a multi-step grid
    # (exercises tiling, the ragged over-read last tile, masked output
    # stores, and the parallel batch axis) — still a small shape.
    batch2 = 40
    x2 = jax.random.normal(k_x, (batch2, IN_FEATURES), dtype=jnp.float32)
    y2 = net_forward(x2, w, b, block_batch=16)
    jax.block_until_ready(y2)
    assert y2.shape == (batch2, OUT_FEATURES)
    assert jnp.allclose(y2, _reference(x2, w, b), atol=2e-2, rtol=2e-2)

    print("KERNEL_OK")
</pallas_src>

<mosaic_0001>
module attributes {stable_mosaic.version = 11 : i64} {
  func.func @linear_kernel(%arg0: i32, %arg1: memref<8x784xf32, #tpu.memory_space<vmem>>, %arg2: memref<784x10xf32, #tpu.memory_space<vmem>>, %arg3: memref<1x10xf32, #tpu.memory_space<vmem>>, %arg4: memref<8x10xf32, #tpu.memory_space<vmem>>) attributes {dimension_semantics = [#tpu.dimension_semantics<parallel>], iteration_bounds = array<i64: 1>, scalar_prefetch = 0 : i64, scratch_operands = 0 : i64, tpu.core_type = #tpu.core_type<tc>, window_params = [{transform_indices = @transform_0, window_bounds = array<i64: 8, 784>}, {pipeline_mode = #tpu.pipeline_mode<synchronous>, transform_indices = @transform_1, window_bounds = array<i64: 784, 10>}, {pipeline_mode = #tpu.pipeline_mode<synchronous>, transform_indices = @transform_2, window_bounds = array<i64: 1, 10>}, {transform_indices = @transform_3, window_bounds = array<i64: 8, 10>}]} {
    %c0 = arith.constant 0 : index
    %c0_0 = arith.constant 0 : index
    %0 = vector.load %arg1[%c0, %c0_0] : memref<8x784xf32, #tpu.memory_space<vmem>>, vector<8x784xf32>
    %c0_1 = arith.constant 0 : index
    %c0_2 = arith.constant 0 : index
    %1 = vector.load %arg2[%c0_1, %c0_2] : memref<784x10xf32, #tpu.memory_space<vmem>>, vector<784x10xf32>
    %cst = arith.constant dense<0.000000e+00> : vector<8x10xf32>
    %2 = tpu.matmul %0, %1, %cst {dimension_numbers = #tpu.dot_dimension_numbers<[1], [0], [0], [1], [0, 0, 1, 1], [], []>} : vector<8x784xf32>, vector<784x10xf32>, vector<8x10xf32> -> vector<8x10xf32>
    %c0_3 = arith.constant 0 : index
    %c0_4 = arith.constant 0 : index
    %3 = vector.load %arg3[%c0_3, %c0_4] : memref<1x10xf32, #tpu.memory_space<vmem>>, vector<1x10xf32>
    %4 = vector.broadcast %3 : vector<1x10xf32> to vector<8x10xf32>
    %5 = arith.addf %2, %4 : vector<8x10xf32>
    %c0_5 = arith.constant 0 : index
    %c0_6 = arith.constant 0 : index
    %6 = vector.load %arg4[%c0_5, %c0_6] : memref<8x10xf32, #tpu.memory_space<vmem>>, vector<8x10xf32>
    tpu.vector_store %arg4[%c0_5, %c0_6], %5 {strides = array<i32>} : memref<8x10xf32, #tpu.memory_space<vmem>>, vector<8x10xf32>,
    return
  }
  func.func @transform_0(%arg0: i32) -> (i32, i32) {
    %c0_i32 = arith.constant 0 : i32
    %c0_i32_0 = arith.constant 0 : i32
    return %arg0, %c0_i32 : i32, i32
  }
  func.func @transform_1(%arg0: i32) -> (i32, i32) {
    %c0_i32 = arith.constant 0 : i32
    %c0_i32_0 = arith.constant 0 : i32
    %c0_i32_1 = arith.constant 0 : i32
    return %c0_i32, %c0_i32_0 : i32, i32
  }
  func.func @transform_2(%arg0: i32) -> (i32, i32) {
    %c0_i32 = arith.constant 0 : i32
    %c0_i32_0 = arith.constant 0 : i32
    %c0_i32_1 = arith.constant 0 : i32
    return %c0_i32, %c0_i32_0 : i32, i32
  }
  func.func @transform_3(%arg0: i32) -> (i32, i32) {
    %c0_i32 = arith.constant 0 : i32
    %c0_i32_0 = arith.constant 0 : i32
    return %arg0, %c0_i32 : i32, i32
  }
}

</mosaic_0001>

<bundles_post_ra>
// kernel: tpu_custom_call.1
= control target key start
LH: loop header
LB: loop body
LE: loop exit
PB: predicated region body
PF: predicated region fallthrough
CT: control target
= control target key end

     0   :  { %s657_s0 = inlined_call_operand.vmem [shape: f32[8,784], index: 0, kind: input, shape index: {}]   ;;  %s658_s1 = inlined_call_operand.vmem [shape: f32[784,10], index: 1, kind: input, shape index: {}]   ;;  %s659_s2 = inlined_call_operand.vmem [shape: f32[1,10], index: 2, kind: input, shape index: {}]   ;;  %s660_s3 = inlined_call_operand.hbm [shape: f32[8,10], index: 3, kind: output, shape index: {}]  }
   0x1   :  { %v37_v0 = vld [vmem:[%s658_s1 + $0x78] sm:$0xff]  ;;  %v36_v1 = vld [vmem:[%s658_s1 + $0x70] sm:$0xff]  ;;  %v35_v4 = vld [vmem:[%s658_s1 + $0x68] sm:$0xff] }
   0x2   :  { %v53_v2 = vld [vmem:[%s658_s1 + $0xf8] sm:$0xff]  ;;  %128 = vmatpush.msra.mxu0 %v37_v0  ;;  %v52_v3 = vld [vmem:[%s658_s1 + $0xf0] sm:$0xff]  ;;  %v51_v5 = vld [vmem:[%s658_s1 + $0xe8] sm:$0xff] }
   0x3   :  { %148 = vmatpush.msra.mxu1 %v53_v2  ;;  %v34_v6 = vld [vmem:[%s658_s1 + $0x60] sm:$0xff]  ;;  %v33_v8 = vld [vmem:[%s658_s1 + $0x58] sm:$0xff]  ;;  %v32_v10 = vld [vmem:[%s658_s1 + $0x50] sm:$0xff] }
   0x4   :  { %129 = vmatpush.msra.mxu0 %v36_v1  ;;  %v50_v7 = vld [vmem:[%s658_s1 + $0xe0] sm:$0xff]  ;;  %v49_v9 = vld [vmem:[%s658_s1 + $0xd8] sm:$0xff]  ;;  %v48_v12 = vld [vmem:[%s658_s1 + $0xd0] sm:$0xff] }
   0x5   :  { %149 = vmatpush.msra.mxu1 %v52_v3  ;;  %v69_v11 = vld [vmem:[%s658_s1 + $0x178] sm:$0xff]  ;;  %v68_v13 = vld [vmem:[%s658_s1 + $0x170] sm:$0xff]  ;;  %v67_v15 = vld [vmem:[%s658_s1 + $0x168] sm:$0xff] }
   0x6   :  { %130 = vmatpush.msra.mxu0 %v35_v4  ;;  %168 = vmatpush.msra.mxu2 %v69_v11  ;;  %v85_v14 = vld [vmem:[%s658_s1 + $0x1f8] sm:$0xff]  ;;  %v84_v16 = vld [vmem:[%s658_s1 + $0x1f0] sm:$0xff]  ;;  %v31_v17 = vld [vmem:[%s658_s1 + $0x48] sm:$0xff] }
   0x7   :  { %150 = vmatpush.msra.mxu1 %v51_v5  ;;  %v47_v18 = vld [vmem:[%s658_s1 + $0xc8] sm:$0xff]  ;;  %188 = vmatpush.msra.mxu3 %v85_v14  ;;  %v66_v19 = vld [vmem:[%s658_s1 + $0x160] sm:$0xff]  ;;  %v65_v23 = vld [vmem:[%s658_s1 + $0x158] sm:$0xff] }
   0x8   :  { %131 = vmatpush.msra.mxu0 %v34_v6  ;;  %169 = vmatpush.msra.mxu2 %v68_v13  ;;  %v83_v20 = vld [vmem:[%s658_s1 + $0x1e8] sm:$0xff]  ;;  %v30_v21 = vld [vmem:[%s658_s1 + $0x40] sm:$0xff]  ;;  %v29_v25 = vld [vmem:[%s658_s1 + $0x38] sm:$0xff] }
   0x9   :  { %151 = vmatpush.msra.mxu1 %v50_v7  ;;  %v46_v22 = vld [vmem:[%s658_s1 + $0xc0] sm:$0xff]  ;;  %189 = vmatpush.msra.mxu3 %v84_v16  ;;  %v45_v26 = vld [vmem:[%s658_s1 + $0xb8] sm:$0xff]  ;;  %v64_v27 = vld [vmem:[%s658_s1 + $0x150] sm:$0xff] }
   0xa   :  { %132 = vmatpush.msra.mxu0 %v33_v8  ;;  %170 = vmatpush.msra.mxu2 %v67_v15  ;;  %v82_v24 = vld [vmem:[%s658_s1 + $0x1e0] sm:$0xff]  ;;  %v81_v28 = vld [vmem:[%s658_s1 + $0x1d8] sm:$0xff]  ;;  %v28_v29 = vld [vmem:[%s658_s1 + $0x30] sm:$0xff] }
   0xb   :  { %152 = vmatpush.msra.mxu1 %v49_v9  ;;  %190 = vmatpush.msra.mxu3 %v83_v20  ;;  %v44_v30 = vld [vmem:[%s658_s1 + $0xb0] sm:$0xff]  ;;  %v63_v31 = vld [vmem:[%s658_s1 + $0x148] sm:$0xff]  ;;  %v62_v35 = vld [vmem:[%s658_s1 + $0x140] sm:$0xff] }
   0xc   :  { %133 = vmatpush.msra.mxu0 %v32_v10  ;;  %171 = vmatpush.msra.mxu2 %v66_v19  ;;  %v80_v32 = vld [vmem:[%s658_s1 + $0x1d0] sm:$0xff]  ;;  %v27_v33 = vld [vmem:[%s658_s1 + $0x28] sm:$0xff]  ;;  %v26_v37 = vld [vmem:[%s658_s1 + $0x20] sm:$0xff] }
   0xd   :  { %153 = vmatpush.msra.mxu1 %v48_v12  ;;  %191 = vmatpush.msra.mxu3 %v82_v24  ;;  %v43_v34 = vld [vmem:[%s658_s1 + $0xa8] sm:$0xff]  ;;  %v42_v38 = vld [vmem:[%s658_s1 + $0xa0] sm:$0xff]  ;;  %v61_v39 = vld [vmem:[%s658_s1 + $0x138] sm:$0xff] }
   0xe   :  { %134 = vmatpush.msra.mxu0 %v31_v17  ;;  %172 = vmatpush.msra.mxu2 %v65_v23  ;;  %v79_v36 = vld [vmem:[%s658_s1 + $0x1c8] sm:$0xff]  ;;  %v78_v40 = vld [vmem:[%s658_s1 + $0x1c0] sm:$0xff]  ;;  %v25_v41 = vld [vmem:[%s658_s1 + $0x18] sm:$0xff] }
   0xf   :  { %154 = vmatpush.msra.mxu1 %v47_v18  ;;  %192 = vmatpush.msra.mxu3 %v81_v28  ;;  %v41_v42 = vld [vmem:[%s658_s1 + $0x98] sm:$0xff]  ;;  %v60_v43 = vld [vmem:[%s658_s1 + $0x130] sm:$0xff]  ;;  %v59_v47 = vld [vmem:[%s658_s1 + $0x128] sm:$0xff] }
  0x10   :  { %135 = vmatpush.msra.mxu0 %v30_v21  ;;  %173 = vmatpush.msra.mxu2 %v64_v27  ;;  %v77_v44 = vld [vmem:[%s658_s1 + $0x1b8] sm:$0xff]  ;;  %v24_v45 = vld [vmem:[%s658_s1 + $0x10] sm:$0xff]  ;;  %v23_v49 = vld [vmem:[%s658_s1 + $0x8] sm:$0xff] }
  0x11   :  { %155 = vmatpush.msra.mxu1 %v46_v22  ;;  %193 = vmatpush.msra.mxu3 %v80_v32  ;;  %v40_v46 = vld [vmem:[%s658_s1 + $0x90] sm:$0xff]  ;;  %v39_v50 = vld [vmem:[%s658_s1 + $0x88] sm:$0xff]  ;;  %v58_v51 = vld [vmem:[%s658_s1 + $0x120] sm:$0xff] }
  0x12   :  { %136 = vmatpush.msra.mxu0 %v29_v25  ;;  %174 = vmatpush.msra.mxu2 %v63_v31  ;;  %v76_v48 = vld [vmem:[%s658_s1 + $0x1b0] sm:$0xff]  ;;  %v75_v52 = vld [vmem:[%s658_s1 + $0x1a8] sm:$0xff]  ;;  %v22_v53 = vld [vmem:[%s658_s1] sm:$0xff] }
  0x13   :  { %156 = vmatpush.msra.mxu1 %v45_v26  ;;  %194 = vmatpush.msra.mxu3 %v79_v36  ;;  %v38_v54 = vld [vmem:[%s658_s1 + $0x80] sm:$0xff]  ;;  %v101_v55 = vld [vmem:[%s658_s1 + $0x278] sm:$0xff]  ;;  %v100_v59 = vld [vmem:[%s658_s1 + $0x270] sm:$0xff] }
  0x14   :  { %137 = vmatpush.msra.mxu0 %v28_v29  ;;  %175 = vmatpush.msra.mxu2 %v62_v35  ;;  %v117_v56 = vld [vmem:[%s658_s1 + $0x2f8] sm:$0xff]  ;;  %v74_v58 = vld [vmem:[%s658_s1 + $0x1a0] sm:$0xff]  ;;  %v116_v60 = vld [vmem:[%s658_s1 + $0x2f0] sm:$0xff] }
  0x15   :  { %157 = vmatpush.msra.mxu1 %v44_v30  ;;  %195 = vmatpush.msra.mxu3 %v78_v40  ;;  %v57_v57 = vld [vmem:[%s658_s1 + $0x118] sm:$0xff]  ;;  %v56_v61 = vld [vmem:[%s658_s1 + $0x110] sm:$0xff]  ;;  %v99_v63 = vld [vmem:[%s658_s1 + $0x268] sm:$0xff] }
  0x16   :  { %138 = vmatpush.msra.mxu0 %v27_v33  ;;  %176 = vmatpush.msra.mxu2 %v61_v39  ;;  %v73_v62 = vld [vmem:[%s658_s1 + $0x198] sm:$0xff]  ;;  %v115_v0 = vld [vmem:[%s658_s1 + $0x2e8] sm:$0xff]  ;;  %v98_v1 = vld [vmem:[%s658_s1 + $0x260] sm:$0xff] }
  0x17   :  { %158 = vmatpush.msra.mxu1 %v43_v34  ;;  %196 = vmatpush.msra.mxu3 %v77_v44  ;;  %v55_v2 = vld [vmem:[%s658_s1 + $0x108] sm:$0xff]  ;;  %v72_v3 = vld [vmem:[%s658_s1 + $0x190] sm:$0xff]  ;;  %v114_v4 = vld [vmem:[%s658_s1 + $0x2e0] sm:$0xff] }
  0x18   :  { %139 = vmatpush.msra.mxu0 %v26_v37  ;;  %177 = vmatpush.msra.mxu2 %v60_v43 }
  0x19   :  { %159 = vmatpush.msra.mxu1 %v42_v38  ;;  %197 = vmatpush.msra.mxu3 %v76_v48 }
  0x1a   :  { %140 = vmatpush.msra.mxu0 %v25_v41  ;;  %178 = vmatpush.msra.mxu2 %v59_v47 }
  0x1b   :  { %160 = vmatpush.msra.mxu1 %v41_v42  ;;  %198 = vmatpush.msra.mxu3 %v75_v52 }
  0x1c   :  { %141 = vmatpush.msra.mxu0 %v24_v45  ;;  %179 = vmatpush.msra.mxu2 %v58_v51 }
  0x1d   :  { %161 = vmatpush.msra.mxu1 %v40_v46  ;;  %199 = vmatpush.msra.mxu3 %v74_v58 }
  0x1e   :  { %142 = vmatpush.msra.mxu0 %v23_v49  ;;  %180 = vmatpush.msra.mxu2 %v57_v57 }
  0x1f   :  { %162 = vmatpush.msra.mxu1 %v39_v50  ;;  %200 = vmatpush.msra.mxu3 %v73_v62 }
  0x20   :  { %143 = vmatpush.msra.mxu0 %v22_v53  ;;  %181 = vmatpush.msra.mxu2 %v56_v61 }
  0x21   :  { %163 = vmatpush.msra.mxu1 %v38_v54 }
  0x22   :  { %208 = vmatpush.msrb.mxu0 %v101_v55 }
  0x23   :  { %228 = vmatpush.msrb.mxu1 %v117_v56 }
  0x24   :  { %209 = vmatpush.msrb.mxu0 %v100_v59 }
  0x25   :  { %229 = vmatpush.msrb.mxu1 %v116_v60 }
  0x26   :  { %8 = vsyncpa [#allocation3], 0  ;;  %210 = vmatpush.msrb.mxu0 %v99_v63  ;;  %v54_v5 = vld [vmem:[%s658_s1 + $0x100] sm:$0xff]  ;;  %v71_v6 = vld [vmem:[%s658_s1 + $0x188] sm:$0xff]  ;;  %182 = vmatpush.msra.mxu2 %v55_v2  ;;  %vm124_vm0 = vcmask 130048   ;;  %s277_s10 = sshll.u32 %s660_s3, 4  ;;  %s278_s10 = int_to_ptr.hbm [resolvable:$true] %s277_s10 }
  0x27   :  { %230 = vmatpush.msrb.mxu1 %v115_v0  ;;  %v97_v7 = vld [vmem:[%s658_s1 + $0x258] sm:$0xff]  ;;  %201 = vmatpush.msra.mxu3 %v72_v3  ;;  %v17_v9 = vld [vmem:[%s657_s0 + $0x10] sm:$0xff]  ;;  %v70_v10 = vld [vmem:[%s658_s1 + $0x180] sm:$0xff]  ;;  %vm268_vm1 = vcmask 80896  }
  0x28   :  { %v113_v8 = vld [vmem:[%s658_s1 + $0x2d8] sm:$0xff]  ;;  %211 = vmatpush.msrb.mxu0 %v98_v1  ;;  %v96_v11 = vld [vmem:[%s658_s1 + $0x250] sm:$0xff]  ;;  %183 = vmatpush.msra.mxu2 %v54_v5  ;;  %v119_v13 = vld [vmem:[%s658_s1 + $0x308] sm:$0xff] }
  0x29   :  { %231 = vmatpush.msrb.mxu1 %v114_v4  ;;  %v112_v12 = vld [vmem:[%s658_s1 + $0x2d0] sm:$0xff]  ;;  %202 = vmatpush.msra.mxu3 %v71_v6  ;;  %v15_v14 = vld [vmem:[%s657_s0] sm:$0xff]  ;;  %v95_v15 = vld [vmem:[%s658_s1 + $0x248] sm:$0xff] }
  0x2a   :  { %212 = vmatpush.msrb.mxu0 %v97_v7  ;;  %v111_v16 = vld [vmem:[%s658_s1 + $0x2c8] sm:$0xff]  ;;  %184 = vmatmul.f32.vlgmr.msra.gmra.mxu2 %v17_v9  ;;  %v18_v17 = vld [vmem:[%s657_s0 + $0x18] sm:$0xff]  ;;  %v94_v19 = vld [vmem:[%s658_s1 + $0x240] sm:$0xff] }
  0x2b   :  { %232 = vmatpush.msrb.mxu1 %v113_v8  ;;  %203 = vmatpush.msra.mxu3 %v70_v10  ;;  %v16_v18 = vld [vmem:[%s657_s0 + $0x8] sm:$0xff]  ;;  %v110_v20 = vld [vmem:[%s658_s1 + $0x2c0] sm:$0xff]  ;;  %v93_v22 = vld [vmem:[%s658_s1 + $0x238] sm:$0xff] }
  0x2c   :  { %213 = vmatpush.msrb.mxu0 %v96_v11  ;;  %262 = vmatpush.msrb.mxu2 %v119_v13  ;;  %v118_v21 = vld [vmem:[%s658_s1 + $0x300] sm:$0xff]  ;;  %v109_v23 = vld [vmem:[%s658_s1 + $0x2b8] sm:$0xff]  ;;  %v21_v24 = vld [vmem:[%s657_s0 + $0x30] sm:$0xff] }
  0x2d   :  { %233 = vmatpush.msrb.mxu1 %v112_v12  ;;  %144 = vmatmul.f32.vlgmr.msra.gmra.mxu0 %v15_v14  ;;  %v92_v25 = vld [vmem:[%s658_s1 + $0x230] sm:$0xff]  ;;  %v91_v27 = vld [vmem:[%s658_s1 + $0x228] sm:$0xff]  ;;  %v90_v29 = vld [vmem:[%s658_s1 + $0x220] sm:$0xff] }
  0x2e   :  { %214 = vmatpush.msrb.mxu0 %v95_v15  ;;  %204 = vmatmul.f32.vlgmr.msra.gmra.mxu3 %v18_v17  ;;  %v108_v26 = vld [vmem:[%s658_s1 + $0x2b0] sm:$0xff]  ;;  %v107_v28 = vld [vmem:[%s658_s1 + $0x2a8] sm:$0xff]  ;;  %v106_v30 = vld [vmem:[%s658_s1 + $0x2a0] sm:$0xff] }
  0x2f   :  { %234 = vmatpush.msrb.mxu1 %v111_v16  ;;  %263 = vmatpush.msrb.mxu2 %v118_v21  ;;  %v89_v31 = vld [vmem:[%s658_s1 + $0x218] sm:$0xff]  ;;  %v88_v33 = vld [vmem:[%s658_s1 + $0x210] sm:$0xff]  ;;  %v87_v35 = vld [vmem:[%s658_s1 + $0x208] sm:$0xff] }
  0x30   :  { %164 = vmatmul.f32.vlgmr.msra.gmra.mxu1 %v16_v18  ;;  %215 = vmatpush.msrb.mxu0 %v94_v19  ;;  %v105_v32 = vld [vmem:[%s658_s1 + $0x298] sm:$0xff]  ;;  %v104_v34 = vld [vmem:[%s658_s1 + $0x290] sm:$0xff]  ;;  %v103_v36 = vld [vmem:[%s658_s1 + $0x288] sm:$0xff] }
  0x31   :  { %235 = vmatpush.msrb.mxu1 %v110_v20  ;;  %v86_v37 = vld [vmem:[%s658_s1 + $0x200] sm:$0xff]  ;;  %v20_v40 = vld [vmem:[%s657_s0 + $0x28] sm:$0xff] }
  0x32   :  { %216 = vmatpush.msrb.mxu0 %v93_v22  ;;  %286 = vmatmul.msk.f32.vlgmr.msrb.gmra.mxu2 %vm124_vm0, %v21_v24  ;;  %v102_v38 = vld [vmem:[%s658_s1 + $0x280] sm:$0xff] }
  0x33   :  { %236 = vmatpush.msrb.mxu1 %v109_v23  ;;  %v19_v39 = vld [vmem:[%s657_s0 + $0x20] sm:$0xff]  ;;  %s315_s0 = smov [#allocation2]  }
  0x34   :  { %217 = vmatpush.msrb.mxu0 %v92_v25  ;;  %v288_v41 = vld [vmem:[%s659_s2] ss:$0 sm:$0xff]  ;;  %s275_s1 = sshll.u32 %s315_s0, 4  ;;  %s276_s1 = int_to_ptr.vmem [resolvable:$true] %s275_s1 }
  0x35   :  { %237 = vmatpush.msrb.mxu1 %v108_v26 }
  0x36   :  { %218 = vmatpush.msrb.mxu0 %v91_v27 }
  0x37   :  { %238 = vmatpush.msrb.mxu1 %v107_v28 }
  0x38   :  { %219 = vmatpush.msrb.mxu0 %v90_v29 }
  0x39   :  { %239 = vmatpush.msrb.mxu1 %v106_v30 }
  0x3a   :  { %220 = vmatpush.msrb.mxu0 %v89_v31 }
  0x3b   :  { %240 = vmatpush.msrb.mxu1 %v105_v32 }
  0x3c   :  { %221 = vmatpush.msrb.mxu0 %v88_v33 }
  0x3d   :  { %241 = vmatpush.msrb.mxu1 %v104_v34 }
  0x3e   :  { %222 = vmatpush.msrb.mxu0 %v87_v35 }
  0x3f   :  { %242 = vmatpush.msrb.mxu1 %v103_v36 }
  0x40   :  { %223 = vmatpush.msrb.mxu0 %v86_v37 }
  0x41   :  { %243 = vmatpush.msrb.mxu1 %v102_v38  ;;  %224 = vmatmul.f32.vlgmr.msrb.gmra.mxu0 %v19_v39 }
  0x42   :  { %244 = vmatmul.f32.vlgmr.msrb.gmra.mxu1 %v20_v40 }
  0xaa   :  { %v145_v42 = vpop.f32.mrf.mxu0 }
  0xab   :  { %v146_v43 = vadd.f32 %v288_v41, %v145_v42 }
  0xad   :  { %v165_v44 = vpop.f32.mrf.mxu1  ;;  %v185_v46 = vpop.f32.mrf.mxu2 }
  0xae   :  { %v166_v45 = vadd.f32 %v165_v44, %v146_v43 }
  0xb0   :  { %v186_v47 = vadd.f32 %v185_v46, %v166_v45 }
  0xb1   :  { %v205_v48 = vpop.f32.mrf.mxu3 }
  0xb2   :  { %v206_v49 = vadd.f32 %v205_v48, %v186_v47 }
  0xb5   :  { %v265_v53 = vpop.f32.mrf.mxu2 }
  0xbe   :  { %v225_v50 = vpop.f32.mrf.mxu0 }
  0xbf   :  { %v245_v51 = vpop.f32.mrf.mxu1  ;;  %v226_v52 = vadd.f32 %v225_v50, %v206_v49 }
  0xc1   :  { %v246_v54 = vadd.f32 %v245_v51, %v226_v52 }
  0xc3   :  { %v266_v55 = vadd.f32 %v265_v53, %v246_v54 }
  0xc5   :  { %269 = vst.msk [vmem:[#allocation2] sm:$0xff] %vm268_vm1, %v266_v55 }
  0xc6   :  { %280 = dma.vmem_to_hbm [thread:$0]  %s276_s1, 128, %s278_s10, [#allocation3]  }
  0xc7   :  { %313 = dma.done.wait [#allocation3], 128  }
  0xc8   :  { %314 = vsyncadd [#allocation3], 4294967168 }
  0xc9   :  { %285 = vsyncpa [#allocation3], 1 }

</bundles_post_ra>
